<compile_context>
chip_gen: v5e
topology: v5e:2x2
jax: 0.10.0
libtpu: 0.0.40
codegen_flags: <defaults>
</compile_context>

<pallas_src>
import functools
import math

import jax
import jax.numpy as jnp
from jax import lax
from jax.experimental import pallas as pl
from jax.experimental.pallas import tpu as pltpu

EMBED_DIM = 64


def _attn_kernel(x_ref, wqkv_ref, bqkv_ref, ctx_ref, attw_ref, *, inv_scale):
    Bb, S, E = x_ref.shape

    # ---- Fused QKV projection: one (Bb*S, E) x (E, 3E) matmul on the MXU ----
    x2d = x_ref[...].reshape(Bb * S, E)                                # (Bb*S, E)
    qkv = jnp.dot(x2d, wqkv_ref[...],
                  preferred_element_type=jnp.float32) + bqkv_ref[...]  # (Bb*S, 3E)
    qkv = qkv.reshape(Bb, S, 3 * E)
    q = qkv[:, :, 0:E]                                                 # (Bb, S, E)
    k = qkv[:, :, E:2 * E]
    v = qkv[:, :, 2 * E:3 * E]

    # ---- scores[b,i,j] = sum_e q[b,i,e] * k[b,j,e]  (no materialized K^T) ----
    scores = lax.dot_general(
        q, k,
        dimension_numbers=(((2,), (2,)), ((0,), (0,))),
        preferred_element_type=jnp.float32) * inv_scale                # (Bb, S, S)

    # ---- numerically stable softmax over the last dim ----
    m = jnp.max(scores, axis=-1, keepdims=True)
    e = jnp.exp(scores - m)
    denom = jnp.sum(e, axis=-1, keepdims=True)                         # (Bb, S, 1)
    inv = pl.reciprocal(denom, approx=True)          # EUP slot (nearly free)
    inv = inv * (2.0 - denom * inv)                  # one Newton step -> f32 exact
    w = e * inv                                                        # (Bb, S, S)

    # ---- context = attention_weights @ V (batched) ----
    ctx = lax.dot_general(
        w, v,
        dimension_numbers=(((2,), (1,)), ((0,), (0,))),
        preferred_element_type=jnp.float32)                            # (Bb, S, E)

    ctx_ref[...] = ctx.astype(ctx_ref.dtype)
    attw_ref[...] = w.astype(attw_ref.dtype)


def _pick_batch_block(B, target=8):
    """Largest divisor of B that is <= target (so blocks tile B exactly)."""
    bb = min(B, target)
    while B % bb:
        bb -= 1
    return bb


def self_attention(x, wq, wk, wv, bq, bk, bv, *, batch_block=8):
    """x: (B, S, E) float32. Returns (context (B,S,E), attention_weights (B,S,S))."""
    B, S, E = x.shape
    inv_scale = 1.0 / math.sqrt(float(E))

    # Pack the three nn.Linear weights into one pre-transposed (E, 3E) matrix
    # and the biases into a single (1, 3E) row, so the kernel does x @ W_qkv.
    w_qkv = jnp.concatenate([wq.T, wk.T, wv.T], axis=1)        # (E, 3E)
    b_qkv = jnp.concatenate([bq, bk, bv]).reshape(1, 3 * E)    # (1, 3E)

    Bb = _pick_batch_block(B, batch_block)
    grid = (B // Bb,)

    kernel = functools.partial(_attn_kernel, inv_scale=inv_scale)

    grid_spec = pltpu.PrefetchScalarGridSpec(
        num_scalar_prefetch=0,
        grid=grid,
        in_specs=[
            pl.BlockSpec((Bb, S, E), lambda b: (b, 0, 0)),     # x (Bb rows / step)
            pl.BlockSpec((E, 3 * E), lambda b: (0, 0)),        # fused Wqkv (resident)
            pl.BlockSpec((1, 3 * E), lambda b: (0, 0)),        # fused bias  (resident)
        ],
        out_specs=[
            pl.BlockSpec((Bb, S, E), lambda b: (b, 0, 0)),     # context
            pl.BlockSpec((Bb, S, S), lambda b: (b, 0, 0)),     # attention weights
        ],
    )

    # Advisory cost for XLA's scheduler around the custom call.
    flops = B * (2 * S * E * 3 * E + 2 * S * S * E + 2 * S * S * E)
    transcendentals = B * S * S
    bytes_accessed = 4 * (B * S * E          # x
                          + E * 3 * E + 3 * E  # weights + biases
                          + B * S * E          # context
                          + B * S * S)         # attention weights
    cost = pl.CostEstimate(flops=flops,
                           transcendentals=transcendentals,
                           bytes_accessed=bytes_accessed)

    return pl.pallas_call(
        kernel,
        grid_spec=grid_spec,
        out_shape=(
            jax.ShapeDtypeStruct((B, S, E), jnp.float32),
            jax.ShapeDtypeStruct((B, S, S), jnp.float32),
        ),
        compiler_params=pltpu.CompilerParams(
            dimension_semantics=("parallel",)),
        cost_estimate=cost,
    )(x, w_qkv, b_qkv)


def _reference(x, wq, wk, wv, bq, bk, bv):
    hp = jax.lax.Precision.HIGHEST
    q = jnp.einsum("bse,oe->bso", x, wq, precision=hp) + bq
    k = jnp.einsum("bse,oe->bso", x, wk, precision=hp) + bk
    v = jnp.einsum("bse,oe->bso", x, wv, precision=hp) + bv
    scores = jnp.einsum("bqe,bke->bqk", q, k, precision=hp) / math.sqrt(x.shape[-1])
    w = jax.nn.softmax(scores, axis=-1)
    ctx = jnp.einsum("bqk,bke->bqe", w, v, precision=hp)
    return ctx, w


if __name__ == "__main__":
    B, S, E = 2, 8, EMBED_DIM
    key = jax.random.PRNGKey(0)
    kx, kq, kk, kv, kbq, kbk, kbv = jax.random.split(key, 7)

    x = jax.random.normal(kx, (B, S, E), dtype=jnp.float32)

    # nn.Linear-shaped params: W (out, in), b (out,)
    bound = 1.0 / math.sqrt(E)
    wq = jax.random.uniform(kq, (E, E), minval=-bound, maxval=bound, dtype=jnp.float32)
    wk = jax.random.uniform(kk, (E, E), minval=-bound, maxval=bound, dtype=jnp.float32)
    wv = jax.random.uniform(kv, (E, E), minval=-bound, maxval=bound, dtype=jnp.float32)
    bq = jax.random.uniform(kbq, (E,), minval=-bound, maxval=bound, dtype=jnp.float32)
    bk = jax.random.uniform(kbk, (E,), minval=-bound, maxval=bound, dtype=jnp.float32)
    bv = jax.random.uniform(kbv, (E,), minval=-bound, maxval=bound, dtype=jnp.float32)

    ctx, attw = self_attention(x, wq, wk, wv, bq, bk, bv)
    jax.block_until_ready((ctx, attw))

    ctx_ref, attw_ref = _reference(x, wq, wk, wv, bq, bk, bv)
    assert ctx.shape == (B, S, E) and attw.shape == (B, S, S)
    assert jnp.allclose(ctx, ctx_ref, atol=1e-4, rtol=1e-4)
    assert jnp.allclose(attw, attw_ref, atol=1e-4, rtol=1e-4)

    print("KERNEL_OK")
</pallas_src>

<mosaic_0001>
module attributes {stable_mosaic.version = 11 : i64} {
  func.func @_attn_kernel(%arg0: i32, %arg1: memref<2x8x64xf32, #tpu.memory_space<vmem>>, %arg2: memref<64x192xf32, #tpu.memory_space<vmem>>, %arg3: memref<1x192xf32, #tpu.memory_space<vmem>>, %arg4: memref<2x8x64xf32, #tpu.memory_space<vmem>>, %arg5: memref<2x8x8xf32, #tpu.memory_space<vmem>>) attributes {dimension_semantics = [#tpu.dimension_semantics<parallel>], iteration_bounds = array<i64: 1>, scalar_prefetch = 0 : i64, scratch_operands = 0 : i64, tpu.core_type = #tpu.core_type<tc>, window_params = [{transform_indices = @transform_0, window_bounds = array<i64: 2, 8, 64>}, {pipeline_mode = #tpu.pipeline_mode<synchronous>, transform_indices = @transform_1, window_bounds = array<i64: 64, 192>}, {pipeline_mode = #tpu.pipeline_mode<synchronous>, transform_indices = @transform_2, window_bounds = array<i64: 1, 192>}, {transform_indices = @transform_3, window_bounds = array<i64: 2, 8, 64>}, {transform_indices = @transform_4, window_bounds = array<i64: 2, 8, 8>}]} {
    %c0 = arith.constant 0 : index
    %c0_0 = arith.constant 0 : index
    %c0_1 = arith.constant 0 : index
    %0 = vector.load %arg1[%c0, %c0_0, %c0_1] : memref<2x8x64xf32, #tpu.memory_space<vmem>>, vector<2x8x64xf32>
    %1 = vector.shape_cast %0 : vector<2x8x64xf32> to vector<16x64xf32>
    %c0_2 = arith.constant 0 : index
    %c0_3 = arith.constant 0 : index
    %2 = vector.load %arg2[%c0_2, %c0_3] : memref<64x192xf32, #tpu.memory_space<vmem>>, vector<64x192xf32>
    %cst = arith.constant dense<0.000000e+00> : vector<16x192xf32>
    %3 = tpu.matmul %1, %2, %cst {dimension_numbers = #tpu.dot_dimension_numbers<[1], [0], [0], [1], [0, 0, 1, 1], [], []>} : vector<16x64xf32>, vector<64x192xf32>, vector<16x192xf32> -> vector<16x192xf32>
    %c0_4 = arith.constant 0 : index
    %c0_5 = arith.constant 0 : index
    %4 = vector.load %arg3[%c0_4, %c0_5] : memref<1x192xf32, #tpu.memory_space<vmem>>, vector<1x192xf32>
    %5 = vector.broadcast %4 : vector<1x192xf32> to vector<16x192xf32>
    %6 = arith.addf %3, %5 : vector<16x192xf32>
    %7 = vector.shape_cast %6 : vector<16x192xf32> to vector<2x8x192xf32>
    %8 = vector.extract_strided_slice %7 {offsets = [0, 0, 0], sizes = [2, 8, 64], strides = [1, 1, 1]} : vector<2x8x192xf32> to vector<2x8x64xf32>
    %9 = vector.extract_strided_slice %7 {offsets = [0, 0, 64], sizes = [2, 8, 64], strides = [1, 1, 1]} : vector<2x8x192xf32> to vector<2x8x64xf32>
    %10 = vector.extract_strided_slice %7 {offsets = [0, 0, 128], sizes = [2, 8, 64], strides = [1, 1, 1]} : vector<2x8x192xf32> to vector<2x8x64xf32>
    %cst_6 = arith.constant dense<0.000000e+00> : vector<2x8x8xf32>
    %11 = tpu.matmul %8, %9, %cst_6 {dimension_numbers = #tpu.dot_dimension_numbers<[2], [2], [1], [1], [0, 0, 0, 1, 1, 1], [0], [0]>} : vector<2x8x64xf32>, vector<2x8x64xf32>, vector<2x8x8xf32> -> vector<2x8x8xf32>
    %cst_7 = arith.constant 1.250000e-01 : f32
    %12 = vector.broadcast %cst_7 : f32 to vector<2x8x8xf32>
    %13 = arith.mulf %11, %12 : vector<2x8x8xf32>
    %cst_8 = arith.constant dense<0xFF800000> : vector<2x8xf32>
    %14 = vector.multi_reduction <maximumf>, %13, %cst_8 [2] : vector<2x8x8xf32> to vector<2x8xf32>
    %15 = vector.shape_cast %14 : vector<2x8xf32> to vector<2x8x1xf32>
    %16 = vector.broadcast %15 : vector<2x8x1xf32> to vector<2x8x8xf32>
    %17 = arith.subf %13, %16 : vector<2x8x8xf32>
    %18 = math.exp %17 : vector<2x8x8xf32>
    %cst_9 = arith.constant dense<0.000000e+00> : vector<2x8xf32>
    %19 = vector.multi_reduction <add>, %18, %cst_9 [2] : vector<2x8x8xf32> to vector<2x8xf32>
    %20 = vector.shape_cast %19 : vector<2x8xf32> to vector<2x8x1xf32>
    %21 = tpu.reciprocal %20 {approx = true} : vector<2x8x1xf32> -> vector<2x8x1xf32>
    %22 = arith.mulf %20, %21 : vector<2x8x1xf32>
    %cst_10 = arith.constant 2.000000e+00 : f32
    %23 = vector.broadcast %cst_10 : f32 to vector<2x8x1xf32>
    %24 = arith.subf %23, %22 : vector<2x8x1xf32>
    %25 = arith.mulf %21, %24 : vector<2x8x1xf32>
    %26 = vector.broadcast %25 : vector<2x8x1xf32> to vector<2x8x8xf32>
    %27 = arith.mulf %18, %26 : vector<2x8x8xf32>
    %cst_11 = arith.constant dense<0.000000e+00> : vector<2x8x64xf32>
    %28 = tpu.matmul %27, %10, %cst_11 {dimension_numbers = #tpu.dot_dimension_numbers<[2], [1], [1], [2], [0, 0, 0, 1, 1, 2], [0], [0]>} : vector<2x8x8xf32>, vector<2x8x64xf32>, vector<2x8x64xf32> -> vector<2x8x64xf32>
    %c0_12 = arith.constant 0 : index
    %c0_13 = arith.constant 0 : index
    %c0_14 = arith.constant 0 : index
    %29 = vector.load %arg4[%c0_12, %c0_13, %c0_14] : memref<2x8x64xf32, #tpu.memory_space<vmem>>, vector<2x8x64xf32>
    tpu.vector_store %arg4[%c0_12, %c0_13, %c0_14], %28 {strides = array<i32>} : memref<2x8x64xf32, #tpu.memory_space<vmem>>, vector<2x8x64xf32>,
    %c0_15 = arith.constant 0 : index
    %c0_16 = arith.constant 0 : index
    %c0_17 = arith.constant 0 : index
    %30 = vector.load %arg5[%c0_15, %c0_16, %c0_17] : memref<2x8x8xf32, #tpu.memory_space<vmem>>, vector<2x8x8xf32>
    tpu.vector_store %arg5[%c0_15, %c0_16, %c0_17], %27 {strides = array<i32>} : memref<2x8x8xf32, #tpu.memory_space<vmem>>, vector<2x8x8xf32>,
    return
  }
  func.func @transform_0(%arg0: i32) -> (i32, i32, i32) {
    %c0_i32 = arith.constant 0 : i32
    %c0_i32_0 = arith.constant 0 : i32
    %c0_i32_1 = arith.constant 0 : i32
    return %arg0, %c0_i32, %c0_i32_0 : i32, i32, i32
  }
  func.func @transform_1(%arg0: i32) -> (i32, i32) {
    %c0_i32 = arith.constant 0 : i32
    %c0_i32_0 = arith.constant 0 : i32
    %c0_i32_1 = arith.constant 0 : i32
    return %c0_i32, %c0_i32_0 : i32, i32
  }
  func.func @transform_2(%arg0: i32) -> (i32, i32) {
    %c0_i32 = arith.constant 0 : i32
    %c0_i32_0 = arith.constant 0 : i32
    %c0_i32_1 = arith.constant 0 : i32
    return %c0_i32, %c0_i32_0 : i32, i32
  }
  func.func @transform_3(%arg0: i32) -> (i32, i32, i32) {
    %c0_i32 = arith.constant 0 : i32
    %c0_i32_0 = arith.constant 0 : i32
    %c0_i32_1 = arith.constant 0 : i32
    return %arg0, %c0_i32, %c0_i32_0 : i32, i32, i32
  }
  func.func @transform_4(%arg0: i32) -> (i32, i32, i32) {
    %c0_i32 = arith.constant 0 : i32
    %c0_i32_0 = arith.constant 0 : i32
    %c0_i32_1 = arith.constant 0 : i32
    return %arg0, %c0_i32, %c0_i32_0 : i32, i32, i32
  }
}

</mosaic_0001>

<bundles_post_ra>
// kernel: tpu_custom_call.1
= control target key start
LH: loop header
LB: loop body
LE: loop exit
PB: predicated region body
PF: predicated region fallthrough
CT: control target
= control target key end

     0   :  { %10 = vsyncpa [#allocation3], 0  ;;  %s546_s0 = inlined_call_operand.hbm [shape: f32[2,8,64], index: 0, kind: input, shape index: {}]   ;;  %s547_s1 = inlined_call_operand.hbm [shape: f32[64,192], index: 1, kind: input, shape index: {}]   ;;  %s548_s2 = inlined_call_operand.hbm [shape: f32[1,192], index: 2, kind: input, shape index: {}]   ;;  %s549_s3 = inlined_call_operand.hbm [shape: f32[2,8,64], index: 3, kind: output, shape index: {0}]   ;;  %s550_s4 = inlined_call_operand.hbm [shape: f32[2,8,8], index: 4, kind: output, shape index: {1}]  }
   0x1   :  { %11 = vsyncpa [#allocation6], 0 }
   0x2   :  { %12 = vsyncpa [#allocation4], 0  ;;  %s31_s17 = sshll.u32 %s547_s1, 4  ;;  %s32_s17 = int_to_ptr.hbm [resolvable:$true] %s31_s17 }
   0x3   :  { %13 = vsyncpa [#allocation10], 0  ;;  %s469_s18 = smov [#allocation5]   ;;  %s18_s22 = sshll.u32 %s546_s0, 4  ;;  %s19_s22 = int_to_ptr.hbm [resolvable:$true] %s18_s22 }
   0x4   :  { %s33_s19 = sshll.u32 %s469_s18, 4  ;;  %s470_s23 = smov 256   ;;  %s34_s19 = int_to_ptr.vmem [resolvable:$true] %s33_s19 }
   0x5   :  { %s471_s24 = smov 16   ;;  %s472_s25 = smov [#allocation2]  }
   0x6   :  { %39 = dma.hbm_to_vmem [thread:$0]  %s32_s17, 2048, %s34_s19, [#allocation6], %s470_s23, %s470_s23, %s471_s24  }
   0x7   :  { %s20_s26 = sshll.u32 %s472_s25, 4  ;;  %s473_s27 = smov 128   ;;  %s21_s26 = int_to_ptr.vmem [resolvable:$true] %s20_s26 }
   0x8   :  { %s474_s28 = smov 8   ;;  %s45_s30 = sshll.u32 %s548_s2, 4  ;;  %s46_s30 = int_to_ptr.hbm [resolvable:$true] %s45_s30 }
   0x9   :  { %26 = dma.hbm_to_vmem [thread:$0]  %s19_s22, 256, %s21_s26, [#allocation3], %s473_s27, %s473_s27, %s474_s28  }
   0xa   :  { %s475_s5 = smov [#allocation7]  }
   0xb   :  { %s47_s0 = sshll.u32 %s475_s5, 4  ;;  %s48_s0 = int_to_ptr.vmem [resolvable:$true] %s47_s0 }
   0xc   :  { %50 = dma.hbm_to_vmem [thread:$0]  %s46_s30, 32, %s48_s0, [#allocation6]  }
   0xd   :  { %461 = dma.done.wait [#allocation3], 256  }
   0xe   :  { %462 = vsyncadd [#allocation3], 4294967040 }
   0xf   :  { %463 = dma.done.wait [#allocation6], 2080  }
  0x10   :  { %464 = vsyncadd [#allocation6], 4294965216  ;;  %v79_v0 = vld [vmem:[#allocation5 + $0x70] sm:$0xff]  ;;  %v77_v1 = vld [vmem:[#allocation5 + $0x60] sm:$0xff]  ;;  %vm87_vm0 = vcmask 523264   ;;  %s476_s2 = smov 64  }
  0x11   :  { %102 = vmatpush.msra.mxu0 %v79_v0  ;;  %v75_v2 = vld [vmem:[#allocation5 + $0x50] sm:$0xff]  ;;  %v73_v3 = vld [vmem:[#allocation5 + $0x40] sm:$0xff]  ;;  %v64_v9 = vld [vmem:[#allocation2 + $0x8] sm:$0xff]  ;;  %vm196_vm1 = vcmask 64512   ;;  %s477_s6 = smov [#allocation9]   ;;  %s294_s10 = sshll.u32 %s550_s4, 4  ;;  %s295_s10 = int_to_ptr.hbm [resolvable:$true] %s294_s10 }
  0x12   :  { %v71_v4 = vld [vmem:[#allocation5 + $0x30] sm:$0xff]  ;;  %v69_v5 = vld [vmem:[#allocation5 + $0x20] sm:$0xff]  ;;  %v80_v18 = vld [vmem:[#allocation5 + $0x78] sm:$0xff]  ;;  %s292_s7 = sshll.u32 %s477_s6, 4  ;;  %s478_s11 = smov [#allocation8]   ;;  %s293_s7 = int_to_ptr.vmem [resolvable:$true] %s292_s7 }
  0x13   :  { %103 = vmatpush.msra.mxu0 %v77_v1  ;;  %v67_v6 = vld [vmem:[#allocation5 + $0x10] sm:$0xff]  ;;  %v65_v7 = vld [vmem:[#allocation5] sm:$0xff]  ;;  %v78_v19 = vld [vmem:[#allocation5 + $0x68] sm:$0xff]  ;;  %125 = vmatpush.msra.mxu1 %v80_v18  ;;  %s279_s12 = sshll.u32 %s478_s11, 4  ;;  %s281_s15 = sshll.u32 %s549_s3, 4  ;;  %s280_s12 = int_to_ptr.vmem [resolvable:$true] %s279_s12  ;;  %s282_s15 = int_to_ptr.hbm [resolvable:$true] %s281_s15 }
  0x14   :  { %v63_v8 = vld [vmem:[#allocation2] sm:$0xff]  ;;  %v81_v10 = vld [vmem:[#allocation7] sm:$0x3]  ;;  %v76_v20 = vld [vmem:[#allocation5 + $0x58] sm:$0xff] }
  0x15   :  { %104 = vmatpush.msra.mxu0 %v75_v2  ;;  %v83_v11 = vperm.slane %v81_v10, 0  ;;  %126 = vmatpush.msra.mxu1 %v78_v19  ;;  %v74_v21 = vld [vmem:[#allocation5 + $0x48] sm:$0xff]  ;;  %v72_v28 = vld [vmem:[#allocation5 + $0x38] sm:$0xff]  ;;  %v84_v42 = vperm.slane %v81_v10, 1 }
  0x16   :  { %v70_v29 = vld [vmem:[#allocation5 + $0x28] sm:$0xff]  ;;  %v68_v30 = vld [vmem:[#allocation5 + $0x18] sm:$0xff] }
  0x17   :  { %105 = vmatpush.msra.mxu0 %v73_v3  ;;  %127 = vmatpush.msra.mxu1 %v76_v20  ;;  %v66_v31 = vld [vmem:[#allocation5 + $0x8] sm:$0xff] }
  0x19   :  { %106 = vmatpush.msra.mxu0 %v71_v4  ;;  %128 = vmatpush.msra.mxu1 %v74_v21 }
  0x1b   :  { %107 = vmatpush.msra.mxu0 %v69_v5  ;;  %129 = vmatpush.msra.mxu1 %v72_v28 }
  0x1d   :  { %108 = vmatpush.msra.mxu0 %v67_v6  ;;  %130 = vmatpush.msra.mxu1 %v70_v29 }
  0x1f   :  { %109 = vmatpush.msra.mxu0 %v65_v7  ;;  %131 = vmatpush.msra.mxu1 %v68_v30 }
  0x20   :  { %313 = vmatmul.msk.f32.vlgmr.msra.gmra.mxu0 %vm87_vm0, %v63_v8 }
  0x21   :  { %132 = vmatpush.msra.mxu1 %v66_v31 }
  0x22   :  { %315 = vmatmul.msk.f32.vlgmr.msra.gmra.mxu1 %vm87_vm0, %v63_v8 }
  0x28   :  { %314 = vmatmul.msk.f32.gmra.mxu0 %vm87_vm0, %v64_v9 }
  0x2a   :  { %316 = vmatmul.msk.f32.gmra.mxu1 %vm87_vm0, %v64_v9 }
  0x9d   :  { %v111_v12 = vpop.f32.mrf.mxu0 }
  0x9e   :  { %v112_v13 = vadd.f32 %v111_v12, %v83_v11 }
  0x9f   :  { %v134_v43 = vpop.f32.mrf.mxu1 }
  0xa0   :  { %141 = vrot.lane.b32.xlu0 %v112_v13, %s476_s2  ;;  %v135_v44 = vadd.f32 %v134_v43, %v84_v42 }
  0xa5   :  { %v114_v14 = vpop.f32.mrf.mxu0 }
  0xa6   :  { %v115_v15 = vadd.f32 %v114_v14, %v83_v11 }
  0xa7   :  { %v137_v45 = vpop.f32.mrf.mxu1 }
  0xa8   :  { %168 = vrot.lane.b32.xlu0 %v115_v15, %s476_s2  ;;  %v138_v46 = vadd.f32 %v137_v45, %v84_v42 }
 0x112   :  { %v142_v16 = vpop.permute.xlu0 %141 }
 0x113   :  { %317 = vmatpush.xpose.msk.msra.mxu2 %vm87_vm0, %v142_v16 }
 0x116   :  { %318 = vmatmul.msk.f32.vlgmr.msra.gmra.mxu2 %vm87_vm0, %v112_v13 }
 0x117   :  { %243 = vmatpush.msrb.mxu2 %v135_v44 }
 0x11a   :  { %v169_v17 = vpop.permute.xlu0 %168 }
 0x11b   :  { %319 = vmatpush.xpose.msk.msra.mxu3 %vm87_vm0, %v169_v17 }
 0x11e   :  { %320 = vmatmul.msk.f32.vlgmr.msra.gmra.mxu3 %vm87_vm0, %v115_v15 }
 0x11f   :  { %266 = vmatpush.msrb.mxu3 %v138_v46 }
 0x199   :  { %v164_v22 = vpop.f32.mrf.mxu2 }
 0x19a   :  { %v194_v23 = vmul.f32 0.125, %v164_v22 }
 0x19c   :  { %v197_v24 = vsel %vm196_vm1, %v194_v23, -inf }
 0x19d   :  { %198 = vmax.xlane.f32.xlu1 %v197_v24 }
 0x1a1   :  { %v191_v25 = vpop.f32.mrf.mxu3 }
 0x1a2   :  { %v195_v26 = vmul.f32 0.125, %v191_v25 }
 0x1a4   :  { %v200_v27 = vsel %vm196_vm1, %v195_v26, -inf }
 0x1a5   :  { %201 = vmax.xlane.f32.xlu1 %v200_v27 }
 0x210   :  { %v199_v32 = vpop.xlane.xlu1 %198 }
 0x211   :  { %v203_v33 = vsub.f32 %v194_v23, %v199_v32 }
 0x213   :  { %v205_v34 = vmul.f32 1.442695, %v203_v33 }
 0x215   :  { %333 = vpow2.f32 %v205_v34 }
 0x218   :  { %v202_v35 = vpop.xlane.xlu1 %201 }
 0x219   :  { %v204_v36 = vsub.f32 %v195_v26, %v202_v35 }
 0x21b   :  { %v334_v37 = vpop.eup %333  ;;  %v207_v38 = vmul.f32 1.442695, %v204_v36 }
 0x21c   :  { %v209_v39 = vsel %vm196_vm1, %v334_v37, 0.0 }
 0x21d   :  { %335 = vpow2.f32 %v207_v38  ;;  %210 = vadd.xlane.f32.xlu2 %v209_v39 }
 0x223   :  { %v336_v40 = vpop.eup %335 }
 0x224   :  { %v212_v41 = vsel %vm196_vm1, %v336_v40, 0.0 }
 0x225   :  { %213 = vadd.xlane.f32.xlu2 %v212_v41 }
 0x290   :  { %v211_v47 = vpop.xlane.xlu2 %210 }
 0x291   :  { %337 = vrcp.f32 %v211_v47 }
 0x297   :  { %v338_v48 = vpop.eup %337 }
 0x298   :  { %v217_v49 = vmul.f32 %v338_v48, %v211_v47  ;;  %v214_v50 = vpop.xlane.xlu2 %213 }
 0x299   :  { %339 = vrcp.f32 %v214_v50 }
 0x29a   :  { %v219_v51 = vsub.f32 2.0, %v217_v49 }
 0x29c   :  { %v221_v52 = vmul.f32 %v338_v48, %v219_v51 }
 0x29e   :  { %v223_v53 = vmul.f32 %v334_v37, %v221_v52 }
 0x29f   :  { %v340_v54 = vpop.eup %339 }
 0x2a0   :  { %273 = vst.msk [vmem:[#allocation9] sm:$0xff] %vm196_vm1, %v223_v53  ;;  %v218_v55 = vmul.f32 %v340_v54, %v214_v50  ;;  %321 = vmatmul.msk.f32.vlgmr.msrb.gmra.mxu2 %vm196_vm1, %v223_v53 }
 0x2a2   :  { %v220_v56 = vsub.f32 2.0, %v218_v55 }
 0x2a4   :  { %v222_v57 = vmul.f32 %v340_v54, %v220_v56 }
 0x2a6   :  { %v224_v58 = vmul.f32 %v336_v40, %v222_v57 }
 0x2a8   :  { %274 = vst.msk [vmem:[#allocation9 + $0x8] sm:$0xff] %vm196_vm1, %v224_v58  ;;  %322 = vmatmul.msk.f32.vlgmr.msrb.gmra.mxu3 %vm196_vm1, %v224_v58 }
 0x2a9   :  { %300 = dma.vmem_to_hbm [thread:$0]  %s293_s7, 256, %s295_s10, [#allocation10], %s473_s27, %s473_s27, %s474_s28  }
 0x323   :  { %v245_v59 = vpop.f32.mrf.mxu2 }
 0x324   :  { %271 = vst.msk [vmem:[#allocation8] sm:$0xff] %vm87_vm0, %v245_v59 }
 0x32b   :  { %v268_v60 = vpop.f32.mrf.mxu3 }
 0x32c   :  { %272 = vst.msk [vmem:[#allocation8 + $0x8] sm:$0xff] %vm87_vm0, %v268_v60 }
 0x32d   :  { %287 = dma.vmem_to_hbm [thread:$0]  %s280_s12, 256, %s282_s15, [#allocation4], %s473_s27, %s473_s27, %s474_s28  }
 0x32e   :  { %465 = dma.done.wait [#allocation4], 256  }
 0x32f   :  { %466 = vsyncadd [#allocation4], 4294967040 }
 0x330   :  { %467 = dma.done.wait [#allocation10], 256  }
 0x331   :  { %468 = vsyncadd [#allocation10], 4294967040 }
 0x332   :  { %309 = vsyncpa [#allocation3], 1 }
 0x333   :  { %310 = vsyncpa [#allocation6], 1 }
 0x334   :  { %311 = vsyncpa [#allocation4], 1 }
 0x335   :  { %312 = vsyncpa [#allocation10], 1 }

</bundles_post_ra>
